<compile_context>
chip_gen: v7x
topology: tpu7x:2x2x1
jax: 0.10.0
libtpu: 0.0.40
codegen_flags: <defaults>
</compile_context>

<pallas_src>
import jax
import jax.numpy as jnp
from jax.experimental import pallas as pl
from jax.experimental.pallas import tpu as pltpu

INPUT_DIM = 5
NUM_CLASSES = 5

PACK = 128                              # batch rows packed per slab row
SLAB_W = INPUT_DIM * PACK               # 640 lanes (multiple of 128) -- needs INPUT_DIM == NUM_CLASSES
SHIFTS = tuple(range(1 - INPUT_DIM, NUM_CLASSES))   # -4 .. 4 (9 shifts)
_ZERO_SHIFT_IDX = SHIFTS.index(0)

MAX_SLAB_TILE = 2048                    # slab rows / step: 2048*640*4 B = 5.24 MB per x tile
TARGET_STEPS = 8                        # aim for >= 8 grid steps (v7x 2 TCs + pipelining)
VMEM_LIMIT_BYTES = 32 * 1024 * 1024     # safe on v5e/v6e/v7x; ~21 MB worst-case buffers


def _cdiv(a, b):
    return (a + b - 1) // b


def _round_up(n, m):
    return _cdiv(n, m) * m


def _shift_lanes(x, d):
    """y[:, j] = x[:, j + d]; lanes with no source are zero (they are always
    multiplied by a zero pattern entry, so the fill value is irrelevant)."""
    tb, _ = x.shape
    if d == 0:
        return x
    zeros = jnp.zeros((tb, abs(d)), dtype=x.dtype)
    if d > 0:
        return jnp.concatenate([x[:, d:], zeros], axis=1)
    return jnp.concatenate([zeros, x[:, :d]], axis=1)


def _linear_slab_kernel(x_ref, pat_ref, bias_ref, o_ref):
    # x_ref:    (TB, 640)  x_ref[r, 5p + k] = x[batch_row(r, p), k]
    # pat_ref:  (9, 640)   pat_ref[i, 5p + c] = W[c, c + d_i]  (0 if c + d_i outside [0, 5))
    # bias_ref: (1, 640)   bias_ref[0, 5p + c] = b[c]
    # o_ref:    (TB, 640)  o_ref[r, 5p + c] = y[batch_row(r, p), c]
    x = x_ref[...]
    pat = pat_ref[...]

    # d = 0 term + bias (bias broadcasts over sublanes).
    acc = bias_ref[...] + x * pat[_ZERO_SHIFT_IDX:_ZERO_SHIFT_IDX + 1, :]

    # Remaining 8 shifted terms: out[:, j] += pattern_d[j] * x[:, j + d].
    # Fully unrolled static loop; all VPU/XLU work, hidden under the DMA stream.
    for i, d in enumerate(SHIFTS):
        if d == 0:
            continue
        acc = acc + _shift_lanes(x, d) * pat[i:i + 1, :]

    o_ref[...] = acc.astype(o_ref.dtype)


def _build_patterns(weight, bias):
    """Precompute the 9 lane-aligned weight patterns and the bias slab (tiny,
    computed once per call in plain XLA; resident in VMEM across the grid)."""
    c = jnp.arange(SLAB_W) % NUM_CLASSES          # output class per lane
    rows = []
    for d in SHIFTS:
        k = c + d
        valid = (k >= 0) & (k < INPUT_DIM)
        kc = jnp.clip(k, 0, INPUT_DIM - 1)
        rows.append(jnp.where(valid, weight[c, kc], jnp.float32(0.0)))
    patterns = jnp.stack(rows).astype(jnp.float32)            # (9, 640)
    bias_slab = jnp.tile(bias, PACK).reshape(1, SLAB_W).astype(jnp.float32)
    return patterns, bias_slab


def linear_max_classifier_forward(x, weight, bias, *,
                                  max_slab_tile=MAX_SLAB_TILE,
                                  target_steps=TARGET_STEPS):
    """Forward pass: x (B, INPUT_DIM) -> logits (B, NUM_CLASSES).

    weight: (NUM_CLASSES, INPUT_DIM)  (PyTorch nn.Linear layout)
    bias:   (NUM_CLASSES,)
    """
    B, d_in = x.shape
    assert d_in == INPUT_DIM
    assert weight.shape == (NUM_CLASSES, INPUT_DIM)
    assert bias.shape == (NUM_CLASSES,)
    # The lane-dense slab trick relies on equal in/out interleave stride.
    assert INPUT_DIM == NUM_CLASSES

    # ----- tile sizing -----------------------------------------------------
    # slab rows = groups of 128 batch rows.  Pick the tile as ~1/target_steps
    # of the work (bounds zero-pad waste to ~1/target_steps), rounded to the
    # 8-sublane granule, capped so double-buffered x+out stays ~21 MB << the
    # 32 MiB VMEM request (portable down to v7x's 64 MiB physical VMEM).
    slab_rows = max(_cdiv(B, PACK), 1)
    tb = max(8, min(max_slab_tile, _round_up(_cdiv(slab_rows, target_steps), 8)))
    num_steps = _cdiv(slab_rows, tb)
    padded_rows = num_steps * tb
    b_pad = padded_rows * PACK

    if b_pad != B:
        # Padded rows produce bias-only junk that is sliced off below.
        x = jnp.pad(x, ((0, b_pad - B), (0, 0)))

    # Free, contiguity-preserving reshape: (b_pad, 5) -> (b_pad/128, 640).
    x_slab = x.reshape(padded_rows, SLAB_W)

    patterns, bias_slab = _build_patterns(weight, bias)

    flops = 2 * B * INPUT_DIM * NUM_CLASSES
    bytes_accessed = 4 * (b_pad * INPUT_DIM + b_pad * NUM_CLASSES
                          + patterns.size + bias_slab.size)

    out_slab = pl.pallas_call(
        _linear_slab_kernel,
        out_shape=jax.ShapeDtypeStruct((padded_rows, SLAB_W), x.dtype),
        grid_spec=pl.GridSpec(
            grid=(num_steps,),
            in_specs=[
                # x streams: one lane-dense (tb, 640) slab tile per step.
                pl.BlockSpec((tb, SLAB_W), lambda i: (i, 0)),
                # weight patterns / bias: full-array blocks, resident in VMEM.
                pl.BlockSpec((len(SHIFTS), SLAB_W), lambda i: (0, 0)),
                pl.BlockSpec((1, SLAB_W), lambda i: (0, 0)),
            ],
            out_specs=pl.BlockSpec((tb, SLAB_W), lambda i: (i, 0)),
        ),
        compiler_params=pltpu.CompilerParams(
            # Independent batch tiles -> shard across TensorCores on v7x.
            dimension_semantics=("parallel",),
            vmem_limit_bytes=VMEM_LIMIT_BYTES,
        ),
        cost_estimate=pl.CostEstimate(
            flops=flops, transcendentals=0, bytes_accessed=bytes_accessed),
    )(x_slab, patterns, bias_slab)

    # Free reshape back to (b_pad, 5), then drop the padded rows.
    return out_slab.reshape(b_pad, NUM_CLASSES)[:B]


if __name__ == "__main__":
    key = jax.random.PRNGKey(0)
    k_w, k_b, k_x1, k_x2 = jax.random.split(key, 4)

    # Deterministic init mimicking nn.Linear's uniform(-1/sqrt(fan_in), ...).
    bound = 1.0 / (INPUT_DIM ** 0.5)
    weight = jax.random.uniform(
        k_w, (NUM_CLASSES, INPUT_DIM), jnp.float32, minval=-bound, maxval=bound)
    bias = jax.random.uniform(
        k_b, (NUM_CLASSES,), jnp.float32, minval=-bound, maxval=bound)

    def reference(xv):
        return jnp.dot(xv, weight.T, precision=jax.lax.Precision.HIGHEST) + bias

    # Small batch consistent with the module (single grid step).
    B1 = 8
    x1 = jax.random.normal(k_x1, (B1, INPUT_DIM), dtype=jnp.float32)
    out1 = jax.block_until_ready(linear_max_classifier_forward(x1, weight, bias))
    assert out1.shape == (B1, NUM_CLASSES)
    assert jnp.allclose(out1, reference(x1), atol=1e-5, rtol=1e-5)

    # Larger ragged batch forcing several streamed grid steps.
    B2 = 3000
    x2 = jax.random.normal(k_x2, (B2, INPUT_DIM), dtype=jnp.float32)
    out2 = jax.block_until_ready(
        linear_max_classifier_forward(x2, weight, bias,
                                      max_slab_tile=8, target_steps=3))
    assert out2.shape == (B2, NUM_CLASSES)
    assert jnp.allclose(out2, reference(x2), atol=1e-5, rtol=1e-5)

    print("KERNEL_OK")
</pallas_src>

<mosaic_0001>
module attributes {stable_mosaic.version = 11 : i64} {
  func.func @_linear_slab_kernel(%arg0: i32, %arg1: memref<8x640xf32, #tpu.memory_space<vmem>>, %arg2: memref<9x640xf32, #tpu.memory_space<vmem>>, %arg3: memref<1x640xf32, #tpu.memory_space<vmem>>, %arg4: memref<8x640xf32, #tpu.memory_space<vmem>>) attributes {dimension_semantics = [#tpu.dimension_semantics<parallel>], iteration_bounds = array<i64: 1>, scalar_prefetch = 0 : i64, scratch_operands = 0 : i64, tpu.core_type = #tpu.core_type<tc>, window_params = [{transform_indices = @transform_0, window_bounds = array<i64: 8, 640>}, {pipeline_mode = #tpu.pipeline_mode<synchronous>, transform_indices = @transform_1, window_bounds = array<i64: 9, 640>}, {pipeline_mode = #tpu.pipeline_mode<synchronous>, transform_indices = @transform_2, window_bounds = array<i64: 1, 640>}, {transform_indices = @transform_3, window_bounds = array<i64: 8, 640>}]} {
    %c0 = arith.constant 0 : index
    %c0_0 = arith.constant 0 : index
    %0 = vector.load %arg1[%c0, %c0_0] : memref<8x640xf32, #tpu.memory_space<vmem>>, vector<8x640xf32>
    %c0_1 = arith.constant 0 : index
    %c0_2 = arith.constant 0 : index
    %1 = vector.load %arg2[%c0_1, %c0_2] : memref<9x640xf32, #tpu.memory_space<vmem>>, vector<9x640xf32>
    %c0_3 = arith.constant 0 : index
    %c0_4 = arith.constant 0 : index
    %2 = vector.load %arg3[%c0_3, %c0_4] : memref<1x640xf32, #tpu.memory_space<vmem>>, vector<1x640xf32>
    %3 = vector.extract_strided_slice %1 {offsets = [4, 0], sizes = [1, 640], strides = [1, 1]} : vector<9x640xf32> to vector<1x640xf32>
    %4 = vector.broadcast %3 : vector<1x640xf32> to vector<8x640xf32>
    %5 = arith.mulf %0, %4 : vector<8x640xf32>
    %6 = vector.broadcast %2 : vector<1x640xf32> to vector<8x640xf32>
    %7 = arith.addf %6, %5 : vector<8x640xf32>
    %cst = arith.constant 0.000000e+00 : f32
    %8 = vector.broadcast %cst : f32 to vector<8x4xf32>
    %9 = vector.extract_strided_slice %0 {offsets = [0, 0], sizes = [8, 636], strides = [1, 1]} : vector<8x640xf32> to vector<8x636xf32>
    %10 = tpu.concatenate %8, %9 in 1 : vector<8x4xf32>, vector<8x636xf32> -> vector<8x640xf32>
    %11 = vector.extract_strided_slice %1 {offsets = [0, 0], sizes = [1, 640], strides = [1, 1]} : vector<9x640xf32> to vector<1x640xf32>
    %12 = vector.broadcast %11 : vector<1x640xf32> to vector<8x640xf32>
    %13 = arith.mulf %10, %12 : vector<8x640xf32>
    %14 = arith.addf %7, %13 : vector<8x640xf32>
    %cst_5 = arith.constant 0.000000e+00 : f32
    %15 = vector.broadcast %cst_5 : f32 to vector<8x3xf32>
    %16 = vector.extract_strided_slice %0 {offsets = [0, 0], sizes = [8, 637], strides = [1, 1]} : vector<8x640xf32> to vector<8x637xf32>
    %17 = tpu.concatenate %15, %16 in 1 : vector<8x3xf32>, vector<8x637xf32> -> vector<8x640xf32>
    %18 = vector.extract_strided_slice %1 {offsets = [1, 0], sizes = [1, 640], strides = [1, 1]} : vector<9x640xf32> to vector<1x640xf32>
    %19 = vector.broadcast %18 : vector<1x640xf32> to vector<8x640xf32>
    %20 = arith.mulf %17, %19 : vector<8x640xf32>
    %21 = arith.addf %14, %20 : vector<8x640xf32>
    %cst_6 = arith.constant 0.000000e+00 : f32
    %22 = vector.broadcast %cst_6 : f32 to vector<8x2xf32>
    %23 = vector.extract_strided_slice %0 {offsets = [0, 0], sizes = [8, 638], strides = [1, 1]} : vector<8x640xf32> to vector<8x638xf32>
    %24 = tpu.concatenate %22, %23 in 1 : vector<8x2xf32>, vector<8x638xf32> -> vector<8x640xf32>
    %25 = vector.extract_strided_slice %1 {offsets = [2, 0], sizes = [1, 640], strides = [1, 1]} : vector<9x640xf32> to vector<1x640xf32>
    %26 = vector.broadcast %25 : vector<1x640xf32> to vector<8x640xf32>
    %27 = arith.mulf %24, %26 : vector<8x640xf32>
    %28 = arith.addf %21, %27 : vector<8x640xf32>
    %cst_7 = arith.constant 0.000000e+00 : f32
    %29 = vector.broadcast %cst_7 : f32 to vector<8x1xf32>
    %30 = vector.extract_strided_slice %0 {offsets = [0, 0], sizes = [8, 639], strides = [1, 1]} : vector<8x640xf32> to vector<8x639xf32>
    %31 = tpu.concatenate %29, %30 in 1 : vector<8x1xf32>, vector<8x639xf32> -> vector<8x640xf32>
    %32 = vector.extract_strided_slice %1 {offsets = [3, 0], sizes = [1, 640], strides = [1, 1]} : vector<9x640xf32> to vector<1x640xf32>
    %33 = vector.broadcast %32 : vector<1x640xf32> to vector<8x640xf32>
    %34 = arith.mulf %31, %33 : vector<8x640xf32>
    %35 = arith.addf %28, %34 : vector<8x640xf32>
    %cst_8 = arith.constant 0.000000e+00 : f32
    %36 = vector.broadcast %cst_8 : f32 to vector<8x1xf32>
    %37 = vector.extract_strided_slice %0 {offsets = [0, 1], sizes = [8, 639], strides = [1, 1]} : vector<8x640xf32> to vector<8x639xf32>
    %38 = tpu.concatenate %37, %36 in 1 : vector<8x639xf32>, vector<8x1xf32> -> vector<8x640xf32>
    %39 = vector.extract_strided_slice %1 {offsets = [5, 0], sizes = [1, 640], strides = [1, 1]} : vector<9x640xf32> to vector<1x640xf32>
    %40 = vector.broadcast %39 : vector<1x640xf32> to vector<8x640xf32>
    %41 = arith.mulf %38, %40 : vector<8x640xf32>
    %42 = arith.addf %35, %41 : vector<8x640xf32>
    %cst_9 = arith.constant 0.000000e+00 : f32
    %43 = vector.broadcast %cst_9 : f32 to vector<8x2xf32>
    %44 = vector.extract_strided_slice %0 {offsets = [0, 2], sizes = [8, 638], strides = [1, 1]} : vector<8x640xf32> to vector<8x638xf32>
    %45 = tpu.concatenate %44, %43 in 1 : vector<8x638xf32>, vector<8x2xf32> -> vector<8x640xf32>
    %46 = vector.extract_strided_slice %1 {offsets = [6, 0], sizes = [1, 640], strides = [1, 1]} : vector<9x640xf32> to vector<1x640xf32>
    %47 = vector.broadcast %46 : vector<1x640xf32> to vector<8x640xf32>
    %48 = arith.mulf %45, %47 : vector<8x640xf32>
    %49 = arith.addf %42, %48 : vector<8x640xf32>
    %cst_10 = arith.constant 0.000000e+00 : f32
    %50 = vector.broadcast %cst_10 : f32 to vector<8x3xf32>
    %51 = vector.extract_strided_slice %0 {offsets = [0, 3], sizes = [8, 637], strides = [1, 1]} : vector<8x640xf32> to vector<8x637xf32>
    %52 = tpu.concatenate %51, %50 in 1 : vector<8x637xf32>, vector<8x3xf32> -> vector<8x640xf32>
    %53 = vector.extract_strided_slice %1 {offsets = [7, 0], sizes = [1, 640], strides = [1, 1]} : vector<9x640xf32> to vector<1x640xf32>
    %54 = vector.broadcast %53 : vector<1x640xf32> to vector<8x640xf32>
    %55 = arith.mulf %52, %54 : vector<8x640xf32>
    %56 = arith.addf %49, %55 : vector<8x640xf32>
    %cst_11 = arith.constant 0.000000e+00 : f32
    %57 = vector.broadcast %cst_11 : f32 to vector<8x4xf32>
    %58 = vector.extract_strided_slice %0 {offsets = [0, 4], sizes = [8, 636], strides = [1, 1]} : vector<8x640xf32> to vector<8x636xf32>
    %59 = tpu.concatenate %58, %57 in 1 : vector<8x636xf32>, vector<8x4xf32> -> vector<8x640xf32>
    %60 = vector.extract_strided_slice %1 {offsets = [8, 0], sizes = [1, 640], strides = [1, 1]} : vector<9x640xf32> to vector<1x640xf32>
    %61 = vector.broadcast %60 : vector<1x640xf32> to vector<8x640xf32>
    %62 = arith.mulf %59, %61 : vector<8x640xf32>
    %63 = arith.addf %56, %62 : vector<8x640xf32>
    %c0_12 = arith.constant 0 : index
    %c0_13 = arith.constant 0 : index
    %64 = vector.load %arg4[%c0_12, %c0_13] : memref<8x640xf32, #tpu.memory_space<vmem>>, vector<8x640xf32>
    tpu.vector_store %arg4[%c0_12, %c0_13], %63 {strides = array<i32>} : memref<8x640xf32, #tpu.memory_space<vmem>>, vector<8x640xf32>,
    return
  }
  func.func @transform_0(%arg0: i32) -> (i32, i32) {
    %c0_i32 = arith.constant 0 : i32
    %c0_i32_0 = arith.constant 0 : i32
    return %arg0, %c0_i32 : i32, i32
  }
  func.func @transform_1(%arg0: i32) -> (i32, i32) {
    %c0_i32 = arith.constant 0 : i32
    %c0_i32_0 = arith.constant 0 : i32
    %c0_i32_1 = arith.constant 0 : i32
    return %c0_i32, %c0_i32_0 : i32, i32
  }
  func.func @transform_2(%arg0: i32) -> (i32, i32) {
    %c0_i32 = arith.constant 0 : i32
    %c0_i32_0 = arith.constant 0 : i32
    %c0_i32_1 = arith.constant 0 : i32
    return %c0_i32, %c0_i32_0 : i32, i32
  }
  func.func @transform_3(%arg0: i32) -> (i32, i32) {
    %c0_i32 = arith.constant 0 : i32
    %c0_i32_0 = arith.constant 0 : i32
    return %arg0, %c0_i32 : i32, i32
  }
}

</mosaic_0001>

<bundles_post_ra>
// kernel: tpu_custom_call.1
= control target key start
LH: loop header
LB: loop body
LE: loop exit
PB: predicated region body
PF: predicated region fallthrough
CT: control target
= control target key end

     0   :  { %8 = vsyncpa [#allocation3], 0  ;;  %s1125_s0 = inlined_call_operand.hbm [shape: f32[8,640], index: 0, kind: input, shape index: {}]   ;;  %s1126_s1 = inlined_call_operand.hbm [shape: f32[9,640], index: 1, kind: input, shape index: {}]   ;;  %s1127_s2 = inlined_call_operand.vmem [shape: f32[1,640], index: 2, kind: input, shape index: {}]   ;;  %s1128_s3 = inlined_call_operand.hbm [shape: f32[8,640], index: 3, kind: output, shape index: {}]  }
   0x1   :  { %9 = vsyncpa [#allocation6], 0 }
   0x2   :  { %10 = vsyncpa [#allocation4], 0  ;;  %s637_s12 = smov [#allocation2]   ;;  %s638_s14 = smov [#allocation5]  }
   0x3   :  { %s17_s13 = sshll.u32 %s637_s12, 4  ;;  %s26_s15 = sshll.u32 %s638_s14, 4  ;;  %s18_s13 = int_to_ptr.vmem [resolvable:$true] %s17_s13  ;;  %s670_s15 = int_to_ptr.vmem [resolvable:$true] %s26_s15 }
   0x4   :  { %s565_s18 = scalar_lea.hbm %s1125_s0, 640 }
   0x5   :  { %p566_p0 = scmp.ne.s32.totalorder %s1125_s0, %s565_s18  ;;  %p569_p1 = scmp.lt.u32.totalorder %s565_s18, %s1125_s0 }
   0x7   :  { %p571_p2 = pnand %p569_p1, %p566_p0 }
   0x9   :  { %574 = shalt.err (!%p571_p2)
}
   0xa   :  { %s575_s23 = scalar_lea.vmem %s18_s13, 640  ;;  %p580_p4 = scmp.lt.s32.totalorder %s18_s13, %s18_s13 }
   0xb   :  { %p576_p3 = scmp.ne.s32.totalorder %s18_s13, %s575_s23  ;;  %p581_p5 = scmp.lt.s32.totalorder %s575_s23, %s575_s23 }
   0xd   :  { %p582_p6 = por %p581_p5, %p580_p4 }
   0xf   :  { %p583_p7 = pnand %p582_p6, %p576_p3 }
  0x11   :  { %586 = shalt.err (!%p583_p7)
}
  0x12   :  { %20 = dma.hbm_to_vmem [thread:$0]  %s1125_s0, 640, %s18_s13, [#allocation3]  }
  0x13   :  { %s587_s28 = scalar_lea.hbm %s1126_s1, 1280 }
  0x14   :  { %p588_p8 = scmp.ne.s32.totalorder %s1126_s1, %s587_s28  ;;  %p591_p9 = scmp.lt.u32.totalorder %s587_s28, %s1126_s1 }
  0x16   :  { %p593_p10 = pnand %p591_p9, %p588_p8 }
  0x18   :  { %596 = shalt.err (!%p593_p10)
}
  0x19   :  { %s597_s6 = scalar_lea.vmem %s670_s15, 1280  ;;  %p602_p12 = scmp.lt.s32.totalorder %s670_s15, %s670_s15 }
  0x1a   :  { %p598_p11 = scmp.ne.s32.totalorder %s670_s15, %s597_s6  ;;  %p603_p13 = scmp.lt.s32.totalorder %s597_s6, %s597_s6 }
  0x1c   :  { %p604_p0 = por %p603_p13, %p602_p12 }
  0x1e   :  { %p605_p1 = pnand %p604_p0, %p598_p11 }
  0x20   :  { %608 = shalt.err (!%p605_p1)
}
  0x21   :  { %s639_s0 = smov 640   ;;  %s640_s7 = smov 40  }
  0x22   :  { %32 = dma.hbm_to_vmem [thread:$0]  %s1126_s1, 1280, %s670_s15, [#allocation6], %s639_s0, %s639_s0, %s640_s7  }
  0x23   :  { %631 = dma.done.wait [#allocation3], 640  }
  0x24   :  { %632 = vsyncadd [#allocation3], 4294966656 }
  0x25   :  { %633 = dma.done.wait [#allocation6], 1280  }
  0x26   :  { %634 = vsyncadd [#allocation6], 4294966016  ;;  %v701_v0 = vld [vmem:[#allocation2 + $0x10] sm:$0xff]  ;;  %v703_v1 = vld [vmem:[#allocation2] sm:$0xff]  ;;  %s641_s10 = smov 4   ;;  %s642_s1 = smov 3   ;;  %v57_v15 = vlaneseq }
  0x27   :  { %122 = vrot.lane.b32.xlu1 %v701_v0, %s641_s10  ;;  %118 = vrot.lane.b32.xlu0 %v703_v1, %s641_s10  ;;  %v707_v2 = vld [vmem:[#allocation2 + $0x18] sm:$0xff]  ;;  %v709_v3 = vld [vmem:[#allocation2 + $0x8] sm:$0xff]  ;;  %v713_v4 = vld [vmem:[#allocation2 + $0x20] sm:$0xff]  ;;  %s643_s11 = smov 2   ;;  %s644_s12 = smov 1   ;;  %vm128_vm0 = vcmask 31744  }
  0x28   :  { %s645_s13 = smov 127   ;;  %s646_s14 = smov 126   ;;  %v775_v18 = vshrl.u32 %v57_v15, 7  ;;  %v782_v22 = vld [vmem:[#allocation5] sm:$0xff]  ;;  %v784_v23 = vld [vmem:[#allocation5 + $0x18] sm:$0xff]  ;;  %v790_v26 = vld [vmem:[#allocation5 + $0x8] sm:$0xff] }
  0x29   :  { %s647_s15 = smov 125   ;;  %s648_s16 = smov 124   ;;  %v792_v27 = vld [vmem:[#allocation5 + $0x10] sm:$0xff]  ;;  %v802_v32 = vld [vmem:[#allocation5 + $0x20] sm:$0xff]  ;;  %v56_v33 = vld [vmem:[%s1127_s2] sm:$0x1f] }
  0x2a   :  { %v59_v21 = vsub.s32 4, %v775_v18  ;;  %v796_v29 = vsub.s32 0, %v775_v18  ;;  %v800_v31 = vsub.s32 3, %v775_v18  ;;  %v810_v36 = vsub.s32 1, %v775_v18  ;;  %s649_s2 = smov [#allocation7]  }
  0x2b   :  { %124 = vrot.lane.b32.xlu1 %v707_v2, %s641_s10  ;;  %120 = vrot.lane.b32.xlu0 %v709_v3, %s641_s10  ;;  %v813_v37 = vsub.s32 2, %v775_v18  ;;  %vm179_vm1 = vcmask 23552   ;;  %v862_v15 = vsub.s32 5, %v775_v18  ;;  %vm230_vm2 = vcmask 15360   ;;  %s537_s19 = sshll.u32 %s649_s2, 4  ;;  %s538_s19 = int_to_ptr.vmem [resolvable:$true] %s537_s19 }
  0x2c   :  { %v60_v28 = vrot.slane %v782_v22, %v59_v21  ;;  %v72_v30 = vrot.slane %v784_v23, %v59_v21  ;;  %v64_v34 = vrot.slane %v790_v26, %v59_v21  ;;  %v68_v35 = vrot.slane %v792_v27, %v59_v21  ;;  %s609_s20 = scalar_lea.vmem %s538_s19, 640  ;;  %p614_p3 = scmp.lt.s32.totalorder %s538_s19, %s538_s19 }
  0x2d   :  { %v76_v40 = vrot.slane %v802_v32, %v59_v21  ;;  %v86_v41 = vrot.slane %v56_v33, %v796_v29  ;;  %v98_v44 = vrot.slane %v56_v33, %v800_v31  ;;  %v90_v47 = vrot.slane %v56_v33, %v810_v36  ;;  %p610_p2 = scmp.ne.s32.totalorder %s538_s19, %s609_s20  ;;  %p615_p4 = scmp.lt.s32.totalorder %s609_s20, %s609_s20 }
  0x2e   :  { %v77_v42 = vmul.f32 %v60_v28, %v703_v1  ;;  %v80_v43 = vmul.f32 %v72_v30, %v707_v2  ;;  %v78_v45 = vmul.f32 %v64_v34, %v709_v3  ;;  %v79_v46 = vmul.f32 %v68_v35, %v701_v0 }
  0x2f   :  { %169 = vrot.lane.b32.xlu1 %v703_v1, %s642_s1  ;;  %126 = vrot.lane.b32.xlu0 %v713_v4, %s641_s10  ;;  %v94_v48 = vrot.slane %v56_v33, %v813_v37  ;;  %v142_v51 = vrot.slane %v782_v22, %v796_v29  ;;  %v154_v52 = vrot.slane %v784_v23, %v796_v29  ;;  %vm281_vm3 = vcmask 7168   ;;  %p616_p5 = por %p615_p4, %p614_p3 }
  0x30   :  { %v193_v53 = vrot.slane %v782_v22, %v810_v36  ;;  %v81_v54 = vmul.f32 %v76_v40, %v713_v4  ;;  %v102_v55 = vrot.slane %v56_v33, %v59_v21  ;;  %v108_v56 = vadd.f32 %v86_v41, %v77_v42 }
  0x31   :  { %v111_v57 = vadd.f32 %v98_v44, %v80_v43  ;;  %v146_v58 = vrot.slane %v790_v26, %v796_v29  ;;  %v150_v59 = vrot.slane %v792_v27, %v796_v29  ;;  %v843_v60 = vadd.f32 %v90_v47, %v78_v45  ;;  %p617_p6 = pnand %p616_p5, %p610_p2 }
  0x32   :  { %v845_v61 = vadd.f32 %v94_v48, %v79_v46  ;;  %v158_v62 = vrot.slane %v802_v32, %v796_v29  ;;  %v197_v63 = vrot.slane %v790_v26, %v810_v36  ;;  %v864_v21 = vadd.f32 %v102_v55, %v81_v54 }
  0x33   :  { %173 = vrot.lane.b32.xlu1 %v701_v0, %s642_s1  ;;  %171 = vrot.lane.b32.xlu0 %v709_v3, %s642_s1  ;;  %v244_v28 = vrot.slane %v782_v22, %v813_v37  ;;  %v248_v29 = vrot.slane %v790_v26, %v813_v37  ;;  %v252_v30 = vrot.slane %v792_v27, %v813_v37  ;;  %v879_v40 = vsub.s32 6, %v775_v18 }
  0x34   :  { %v901_v55 = vsub.s32 7, %v775_v18  ;;  %v358_v35 = vrot.slane %v784_v23, %v862_v15  ;;  %v362_v18 = vrot.slane %v802_v32, %v862_v15  ;;  %vm332_vm4 = vcmask 1039360  }
  0x35   :  { %vm383_vm5 = vcmask 1031168   ;;  %vm434_vm6 = vcmask 1022976   ;;  %vm485_vm7 = vcmask 1014784  }
  0x37   :  { %177 = vrot.lane.b32.xlu1 %v713_v4, %s642_s1  ;;  %175 = vrot.lane.b32.xlu0 %v707_v2, %s642_s1 }
  0x3b   :  { %222 = vrot.lane.b32.xlu1 %v709_v3, %s643_s11  ;;  %220 = vrot.lane.b32.xlu0 %v703_v1, %s643_s11 }
  0x3f   :  { %226 = vrot.lane.b32.xlu1 %v707_v2, %s643_s11  ;;  %224 = vrot.lane.b32.xlu0 %v701_v0, %s643_s11 }
  0x43   :  { %271 = vrot.lane.b32.xlu1 %v703_v1, %s644_s12  ;;  %228 = vrot.lane.b32.xlu0 %v713_v4, %s643_s11 }
  0x47   :  { %275 = vrot.lane.b32.xlu1 %v701_v0, %s644_s12  ;;  %273 = vrot.lane.b32.xlu0 %v709_v3, %s644_s12 }
  0x4b   :  { %279 = vrot.lane.b32.xlu1 %v713_v4, %s644_s12  ;;  %277 = vrot.lane.b32.xlu0 %v707_v2, %s644_s12 }
  0x4f   :  { %324 = vrot.lane.b32.xlu1 %v709_v3, %s645_s13  ;;  %322 = vrot.lane.b32.xlu0 %v703_v1, %s645_s13 }
  0x53   :  { %328 = vrot.lane.b32.xlu1 %v707_v2, %s645_s13  ;;  %326 = vrot.lane.b32.xlu0 %v701_v0, %s645_s13 }
  0x57   :  { %373 = vrot.lane.b32.xlu1 %v703_v1, %s646_s14  ;;  %330 = vrot.lane.b32.xlu0 %v713_v4, %s645_s13 }
  0x5b   :  { %377 = vrot.lane.b32.xlu1 %v701_v0, %s646_s14  ;;  %375 = vrot.lane.b32.xlu0 %v709_v3, %s646_s14 }
  0x5f   :  { %381 = vrot.lane.b32.xlu1 %v713_v4, %s646_s14  ;;  %379 = vrot.lane.b32.xlu0 %v707_v2, %s646_s14 }
  0x63   :  { %426 = vrot.lane.b32.xlu1 %v709_v3, %s647_s15  ;;  %424 = vrot.lane.b32.xlu0 %v703_v1, %s647_s15 }
  0x67   :  { %430 = vrot.lane.b32.xlu1 %v707_v2, %s647_s15  ;;  %428 = vrot.lane.b32.xlu0 %v701_v0, %s647_s15 }
  0x6b   :  { %475 = vrot.lane.b32.xlu1 %v703_v1, %s648_s16  ;;  %432 = vrot.lane.b32.xlu0 %v713_v4, %s647_s15 }
  0x6f   :  { %479 = vrot.lane.b32.xlu1 %v701_v0, %s648_s16  ;;  %477 = vrot.lane.b32.xlu0 %v709_v3, %s648_s16  ;;  %v205_v3 = vrot.slane %v784_v23, %v810_v36 }
  0x73   :  { %483 = vrot.lane.b32.xlu1 %v713_v4, %s648_s16  ;;  %481 = vrot.lane.b32.xlu0 %v707_v2, %s648_s16  ;;  %v201_v2 = vrot.slane %v792_v27, %v810_v36  ;;  %v209_v4 = vrot.slane %v802_v32, %v810_v36 }
  0x99   :  { %v751_v5 = vpop.permute.xlu1 %122  ;;  %v753_v6 = vpop.permute.xlu0 %118 }
  0x9a   :  { %v138_v41 = vsel %vm128_vm0, 0.0, %v753_v6 }
  0x9b   :  { %v159_v48 = vmul.f32 %v142_v51, %v138_v41  ;;  %v452_v51 = vrot.slane %v790_v26, %v901_v55 }
  0x9d   :  { %v755_v7 = vpop.permute.xlu1 %124  ;;  %v757_v8 = vpop.permute.xlu0 %120 }
  0x9e   :  { %v131_v47 = vsel %vm128_vm0, %v751_v5, %v755_v7  ;;  %v129_v44 = vsel %vm128_vm0, %v753_v6, %v757_v8  ;;  %v130_v54 = vsel %vm128_vm0, %v757_v8, %v751_v5  ;;  %v405_v5 = vrot.slane %v792_v27, %v879_v40 }
  0x9f   :  { %v162_v34 = vmul.f32 %v154_v52, %v131_v47  ;;  %v160_v8 = vmul.f32 %v146_v58, %v129_v44  ;;  %v161_v6 = vmul.f32 %v150_v59, %v130_v54  ;;  %v164_v44 = vadd.f32 %v159_v48, %v108_v56 }
  0xa0   :  { %v464_v59 = vrot.slane %v802_v32, %v901_v55 }
  0xa1   :  { %v759_v9 = vpop.permute.xlu1 %169  ;;  %v761_v10 = vpop.permute.xlu0 %126  ;;  %v167_v54 = vadd.f32 %v162_v34, %v111_v57  ;;  %v165_v47 = vadd.f32 %v160_v8, %v843_v60 }
  0xa2   :  { %v189_v41 = vsel %vm179_vm1, 0.0, %v759_v9  ;;  %v132_v42 = vsel %vm128_vm0, %v755_v7, %v761_v10 }
  0xa3   :  { %v210_v7 = vmul.f32 %v193_v53, %v189_v41  ;;  %v163_v58 = vmul.f32 %v158_v62, %v132_v42 }
  0xa5   :  { %v763_v11 = vpop.permute.xlu1 %173  ;;  %v765_v12 = vpop.permute.xlu0 %171 }
  0xa6   :  { %v180_v52 = vsel %vm179_vm1, %v759_v9, %v765_v12  ;;  %v181_v10 = vsel %vm179_vm1, %v765_v12, %v763_v11  ;;  %v166_v12 = vadd.f32 %v161_v6, %v845_v61 }
  0xa9   :  { %v767_v13 = vpop.permute.xlu1 %177  ;;  %v769_v14 = vpop.permute.xlu0 %175 }
  0xaa   :  { %v182_v56 = vsel %vm179_vm1, %v763_v11, %v769_v14  ;;  %v183_v57 = vsel %vm179_vm1, %v769_v14, %v767_v13  ;;  %v211_v11 = vmul.f32 %v197_v63, %v180_v52  ;;  %v212_v13 = vmul.f32 %v201_v2, %v181_v10 }
  0xab   :  { %v213_v14 = vmul.f32 %v205_v3, %v182_v56 }
  0xac   :  { %v217_v41 = vadd.f32 %v212_v13, %v166_v12 }
  0xad   :  { %v771_v16 = vpop.permute.xlu1 %222  ;;  %v773_v17 = vpop.permute.xlu0 %220  ;;  %v218_v52 = vadd.f32 %v213_v14, %v167_v54  ;;  %v1135_v14 = vrot.slane %v802_v32, %v800_v31 }
  0xae   :  { %v240_v53 = vsel %vm230_vm2, 0.0, %v773_v17  ;;  %v231_v34 = vsel %vm230_vm2, %v773_v17, %v771_v16  ;;  %v215_v17 = vadd.f32 %v210_v7, %v164_v44  ;;  %v1132_v7 = vrot.slane %v790_v26, %v800_v31 }
  0xaf   :  { %v261_v63 = vmul.f32 %v244_v28, %v240_v53  ;;  %v262_v6 = vmul.f32 %v248_v29, %v231_v34  ;;  %v216_v28 = vadd.f32 %v211_v11, %v165_v47 }
  0xb1   :  { %v777_v19 = vpop.permute.xlu1 %226  ;;  %v779_v20 = vpop.permute.xlu0 %224  ;;  %v266_v44 = vadd.f32 %v261_v63, %v215_v17 }
  0xb2   :  { %v232_v60 = vsel %vm230_vm2, %v771_v16, %v779_v20  ;;  %v233_v61 = vsel %vm230_vm2, %v779_v20, %v777_v19  ;;  %v214_v16 = vmul.f32 %v209_v4, %v183_v57  ;;  %v168_v20 = vadd.f32 %v163_v58, %v864_v21 }
  0xb3   :  { %v263_v36 = vmul.f32 %v252_v30, %v232_v60  ;;  %v1130_v21 = vrot.slane %v782_v22, %v800_v31  ;;  %v1131_v30 = vrot.slane %v802_v32, %v813_v37  ;;  %v267_v57 = vadd.f32 %v262_v6, %v216_v28 }
  0xb4   :  { %v219_v47 = vadd.f32 %v214_v16, %v168_v20  ;;  %v1134_v60 = vrot.slane %v784_v23, %v800_v31  ;;  %v1136_v16 = vrot.slane %v782_v22, %v862_v15 }
  0xb5   :  { %v786_v24 = vpop.permute.xlu1 %271  ;;  %v788_v25 = vpop.permute.xlu0 %228  ;;  %v268_v53 = vadd.f32 %v263_v36, %v217_v41 }
  0xb6   :  { %v291_v62 = vsel %vm281_vm3, 0.0, %v786_v24  ;;  %v234_v2 = vsel %vm230_vm2, %v777_v19, %v788_v25  ;;  %v1129_v19 = vrot.slane %v784_v23, %v813_v37  ;;  %v1133_v37 = vrot.slane %v792_v27, %v800_v31 }
  0xb7   :  { %v312_v8 = vmul.f32 %v1130_v21, %v291_v62  ;;  %v265_v58 = vmul.f32 %v1131_v30, %v234_v2 }
  0xb8   :  { %v264_v25 = vmul.f32 %v1129_v19, %v233_v61 }
  0xb9   :  { %v815_v38 = vpop.permute.xlu1 %275  ;;  %v817_v39 = vpop.permute.xlu0 %273  ;;  %v317_v34 = vadd.f32 %v312_v8, %v266_v44  ;;  %v1141_v44 = vrot.slane %v782_v22, %v901_v55 }
  0xba   :  { %v282_v4 = vsel %vm281_vm3, %v786_v24, %v817_v39  ;;  %v283_v29 = vsel %vm281_vm3, %v817_v39, %v815_v38  ;;  %v269_v11 = vadd.f32 %v264_v25, %v218_v52  ;;  %v1140_v52 = vrot.slane %v790_v26, %v879_v40 }
  0xbb   :  { %v313_v10 = vmul.f32 %v1132_v7, %v282_v4  ;;  %v314_v12 = vmul.f32 %v1133_v37, %v283_v29 }
  0xbd   :  { %v828_v49 = vpop.permute.xlu1 %279  ;;  %v830_v50 = vpop.permute.xlu0 %277  ;;  %v318_v17 = vadd.f32 %v313_v10, %v267_v57  ;;  %v319_v6 = vadd.f32 %v314_v12, %v268_v53  ;;  %v1142_v53 = vrot.slane %v784_v23, %v879_v40  ;;  %v548_v12 = vld [vmem:[#allocation5 + $0x30] ss:$0 sm:$0xff] }
  0xbe   :  { %v284_v24 = vsel %vm281_vm3, %v815_v38, %v830_v50  ;;  %v285_v39 = vsel %vm281_vm3, %v830_v50, %v828_v49  ;;  %v270_v50 = vadd.f32 %v265_v58, %v219_v47 }
  0xbf   :  { %v315_v13 = vmul.f32 %v1134_v60, %v284_v24  ;;  %v316_v61 = vmul.f32 %v1135_v14, %v285_v39  ;;  %v1145_v14 = vrot.slane %v784_v23, %v901_v55 }
  0xc1   :  { %v851_v0 = vpop.permute.xlu1 %324  ;;  %v853_v1 = vpop.permute.xlu0 %322  ;;  %v320_v28 = vadd.f32 %v315_v13, %v269_v11  ;;  %v321_v21 = vadd.f32 %v316_v61, %v270_v50  ;;  %v1143_v11 = vrot.slane %v802_v32, %v879_v40 }
  0xc2   :  { %v333_v38 = vsel %vm332_vm4, %v853_v1, %v851_v0 }
  0xc3   :  { %v363_v63 = vmul.f32 %v1136_v16, %v333_v38 }
  0xc5   :  { %v889_v45 = vpop.permute.xlu1 %328  ;;  %v891_v46 = vpop.permute.xlu0 %326  ;;  %v368_v41 = vadd.f32 %v363_v63, %v317_v34 }
  0xc6   :  { %v334_v49 = vsel %vm332_vm4, %v851_v0, %v891_v46  ;;  %v335_v1 = vsel %vm332_vm4, %v891_v46, %v889_v45  ;;  %v1137_v46 = vrot.slane %v790_v26, %v862_v15  ;;  %v1144_v26 = vrot.slane %v792_v27, %v901_v55 }
  0xc8   :  { %v364_v36 = vmul.f32 %v1137_v46, %v334_v49 }
  0xc9   :  { %v919_v33 = vpop.permute.xlu1 %373  ;;  %v921_v43 = vpop.permute.xlu0 %330 }
  0xca   :  { %v336_v62 = vsel %vm332_vm4, %v889_v45, %v921_v43  ;;  %v342_v0 = vsel %vm332_vm4, %v921_v43, 0.0  ;;  %v1138_v43 = vrot.slane %v792_v27, %v862_v15 }
  0xcb   :  { %v367_v8 = vmul.f32 %v362_v18, %v342_v0  ;;  %v369_v18 = vadd.f32 %v364_v36, %v318_v17  ;;  %v551_v0 = vld [vmem:[#allocation5 + $0x48] ss:$0 sm:$0xff] }
  0xcc   :  { %v365_v19 = vmul.f32 %v1138_v43, %v335_v1 }
  0xcd   :  { %v958_v9 = vpop.permute.xlu1 %377  ;;  %v376_v48 = vpop.permute.xlu0 %375 }
  0xce   :  { %v384_v31 = vsel %vm383_vm5, %v919_v33, %v376_v48  ;;  %v385_v45 = vsel %vm383_vm5, %v376_v48, %v958_v9  ;;  %v366_v33 = vmul.f32 %v358_v35, %v336_v62  ;;  %v1139_v48 = vrot.slane %v782_v22, %v879_v40  ;;  %v547_v22 = vld [vmem:[#allocation5 + $0x28] ss:$0 sm:$0xff] }
  0xcf   :  { %v415_v30 = vmul.f32 %v1140_v52, %v385_v45  ;;  %v370_v39 = vadd.f32 %v365_v19, %v319_v6 }
  0xd1   :  { %v382_v3 = vpop.permute.xlu1 %381  ;;  %v380_v42 = vpop.permute.xlu0 %379  ;;  %v420_v38 = vadd.f32 %v415_v30, %v369_v18 }
  0xd2   :  { %v386_v4 = vsel %vm383_vm5, %v958_v9, %v380_v42  ;;  %v414_v9 = vmul.f32 %v1139_v48, %v384_v31  ;;  %v387_v35 = vsel %vm383_vm5, %v380_v42, %v382_v3  ;;  %v393_v47 = vsel %vm383_vm5, %v382_v3, 0.0  ;;  %v549_v31 = vld [vmem:[#allocation5 + $0x38] ss:$0 sm:$0xff] }
  0xd3   :  { %v416_v58 = vmul.f32 %v405_v5, %v386_v4  ;;  %v372_v5 = vadd.f32 %v367_v8, %v321_v21  ;;  %v417_v3 = vmul.f32 %v1142_v53, %v387_v35  ;;  %v418_v34 = vmul.f32 %v1143_v11, %v393_v47 }
  0xd4   :  { %v419_v57 = vadd.f32 %v414_v9, %v368_v41 }
  0xd5   :  { %v427_v56 = vpop.permute.xlu1 %426  ;;  %v425_v54 = vpop.permute.xlu0 %424  ;;  %v421_v60 = vadd.f32 %v416_v58, %v370_v39 }
  0xd6   :  { %v435_v25 = vsel %vm434_vm6, %v425_v54, %v427_v56 }
  0xd7   :  { %v465_v7 = vmul.f32 %v1141_v44, %v435_v25 }
  0xd9   :  { %v431_v2 = vpop.permute.xlu1 %430  ;;  %v429_v20 = vpop.permute.xlu0 %428  ;;  %v470_v50 = vadd.f32 %v465_v7, %v419_v57 }
  0xda   :  { %v436_v29 = vsel %vm434_vm6, %v427_v56, %v429_v20  ;;  %v437_v10 = vsel %vm434_vm6, %v429_v20, %v431_v2  ;;  %v371_v56 = vadd.f32 %v366_v33, %v320_v28  ;;  %v423_v20 = vadd.f32 %v418_v34, %v372_v5 }
  0xdb   :  { %v466_v42 = vmul.f32 %v452_v51, %v436_v29  ;;  %v467_v51 = vmul.f32 %v1144_v26, %v437_v10 }
  0xdc   :  { %v422_v27 = vadd.f32 %v417_v3, %v371_v56 }
  0xdd   :  { %v476_v24 = vpop.permute.xlu1 %475  ;;  %v433_v15 = vpop.permute.xlu0 %432  ;;  %v471_v17 = vadd.f32 %v466_v42, %v420_v38  ;;  %v472_v6 = vadd.f32 %v467_v51, %v421_v60 }
  0xde   :  { %v438_v54 = vsel %vm434_vm6, %v431_v2, %v433_v15  ;;  %v444_v37 = vsel %vm434_vm6, %v433_v15, 0.0  ;;  %v550_v2 = vld [vmem:[#allocation5 + $0x40] ss:$0 sm:$0xff] }
  0xdf   :  { %v468_v61 = vmul.f32 %v1145_v14, %v438_v54  ;;  %v469_v40 = vmul.f32 %v464_v59, %v444_v37 }
  0xe1   :  { %v480_v13 = vpop.permute.xlu1 %479  ;;  %v478_v49 = vpop.permute.xlu0 %477  ;;  %v473_v4 = vadd.f32 %v468_v61, %v422_v27  ;;  %v474_v55 = vadd.f32 %v469_v40, %v423_v20 }
  0xe2   :  { %v486_v1 = vsel %vm485_vm7, %v476_v24, %v478_v49  ;;  %v487_v62 = vsel %vm485_vm7, %v478_v49, %v480_v13 }
  0xe3   :  { %v516_v16 = vmul.f32 %v547_v22, %v486_v1  ;;  %v517_v63 = vmul.f32 %v548_v12, %v487_v62 }
  0xe5   :  { %v521_v46 = vadd.f32 %v516_v16, %v470_v50  ;;  %v522_v23 = vadd.f32 %v517_v63, %v471_v17  ;;  %v484_v36 = vpop.permute.xlu1 %483  ;;  %v482_v45 = vpop.permute.xlu0 %481 }
  0xe6   :  { %v495_v28 = vsel %vm485_vm7, %v484_v36, 0.0  ;;  %v488_v43 = vsel %vm485_vm7, %v480_v13, %v482_v45  ;;  %v489_v32 = vsel %vm485_vm7, %v482_v45, %v484_v36 }
  0xe7   :  { %526 = vst [vmem:[#allocation7] sm:$0xff] %v521_v46  ;;  %527 = vst [vmem:[#allocation7 + $0x8] sm:$0xff] %v522_v23  ;;  %v520_v59 = vmul.f32 %v551_v0, %v495_v28  ;;  %v518_v19 = vmul.f32 %v549_v31, %v488_v43  ;;  %v519_v33 = vmul.f32 %v550_v2, %v489_v32 }
  0xe9   :  { %v525_v25 = vadd.f32 %v520_v59, %v474_v55  ;;  %v523_v21 = vadd.f32 %v518_v19, %v472_v6  ;;  %v524_v8 = vadd.f32 %v519_v33, %v473_v4 }
  0xeb   :  { %530 = vst [vmem:[#allocation7 + $0x20] sm:$0xff] %v525_v25  ;;  %528 = vst [vmem:[#allocation7 + $0x10] sm:$0xff] %v523_v21 }
  0xec   :  { %529 = vst [vmem:[#allocation7 + $0x18] sm:$0xff] %v524_v8 }
  0xed   :  { %620 = shalt.err (!%p617_p6)
}
  0xee   :  { %s621_s23 = scalar_lea.hbm %s1128_s3, 640 }
  0xef   :  { %p622_p7 = scmp.ne.s32.totalorder %s1128_s3, %s621_s23  ;;  %p625_p8 = scmp.lt.u32.totalorder %s621_s23, %s1128_s3 }
  0xf1   :  { %p627_p9 = pnand %p625_p8, %p622_p7 }
  0xf3   :  { %630 = shalt.err (!%p627_p9)
}
  0xf4   :  { %540 = dma.vmem_to_hbm [thread:$0]  %s538_s19, 640, %s1128_s3, [#allocation4]  }
  0xf5   :  { %635 = dma.done.wait [#allocation4], 640  }
  0xf6   :  { %636 = vsyncadd [#allocation4], 4294966656 }
  0xf7   :  { %544 = vsyncpa [#allocation3], 1 }
  0xf8   :  { %545 = vsyncpa [#allocation6], 1 }
  0xf9   :  { %546 = vsyncpa [#allocation4], 1 }

</bundles_post_ra>
